<compile_context>
chip_gen: v7x
topology: tpu7x:2x2x1
jax: 0.10.0
libtpu: 0.0.40
codegen_flags: <defaults>
</compile_context>

<pallas_src>
import jax
import jax.numpy as jnp
from jax.experimental import pallas as pl
from jax.experimental.pallas import tpu as pltpu

LANE = 128  # lane width of a vreg / MXU column granularity


def _round_up(x, m):
    return (x + m - 1) // m * m


def _pad2d(a, rows, cols):
    r, c = a.shape
    return jnp.pad(a, ((0, rows - r), (0, cols - c)))


# ---------------------------------------------------------------------------
# Kernel: one batch tile of the full 4-layer MLP.
# ---------------------------------------------------------------------------
def mlp_kernel(x_ref,
               w1_ref, b1_ref,
               w2_ref, b2_ref,
               w3_ref, b3_ref,
               w4_ref, b4_ref,
               o_ref):
    cdt = w1_ref.dtype                     # MXU input dtype (bf16 or f32)
    bf16_act = cdt == jnp.bfloat16

    def hidden(h, w_ref, b_ref):
        # MXU matmul with f32 accumulation; bias add in f32.
        acc = jnp.dot(h, w_ref[...], preferred_element_type=jnp.float32)
        acc = acc + b_ref[...]
        if bf16_act:
            # bf16 tanh (native EUP on v6e/v7x); result feeds the next MXU
            # pass directly, no extra cast.
            return jnp.tanh(acc.astype(jnp.bfloat16))
        return jnp.tanh(acc)

    h = hidden(x_ref[...], w1_ref, b1_ref)
    h = hidden(h, w2_ref, b2_ref)
    h = hidden(h, w3_ref, b3_ref)
    y = jnp.dot(h, w4_ref[...], preferred_element_type=jnp.float32) + b4_ref[...]
    o_ref[...] = y.astype(o_ref.dtype)     # exact-width (tile_b, output_dim) store


# ---------------------------------------------------------------------------
# One-time parameter preparation (hoisted out of the per-call path).
# ---------------------------------------------------------------------------
def prepare_params(params, compute_dtype=jnp.bfloat16):
    """Pad hidden dims to 128 lanes and cast weights to the MXU input dtype.

    Padding is exact: pad weights/biases are zero and tanh(0) == 0, so padded
    hidden lanes stay zero and valid lanes match the unpadded math."""
    cdt = jnp.dtype(compute_dtype)
    w1, w2, w3, w4 = params["w1"], params["w2"], params["w3"], params["w4"]
    b1, b2, b3, b4 = params["b1"], params["b2"], params["b3"], params["b4"]
    input_dim = w1.shape[0]
    h1_p = _round_up(w1.shape[1], LANE)
    h2_p = _round_up(w2.shape[1], LANE)
    h3_p = _round_up(w3.shape[1], LANE)
    output_dim = w4.shape[1]                       # output width stays true
    return {
        # x keeps its true feature width, so w1 rows stay = input_dim.
        "w1": _pad2d(w1, input_dim, h1_p).astype(cdt),
        "w2": _pad2d(w2, h1_p, h2_p).astype(cdt),
        "w3": _pad2d(w3, h2_p, h3_p).astype(cdt),
        "w4": _pad2d(w4, h3_p, output_dim).astype(cdt),
        # Biases stay f32: added to the f32 MXU accumulators.
        "b1": _pad2d(b1, 1, h1_p).astype(jnp.float32),
        "b2": _pad2d(b2, 1, h2_p).astype(jnp.float32),
        "b3": _pad2d(b3, 1, h3_p).astype(jnp.float32),
        "b4": b4.astype(jnp.float32),
    }


def _vmem_cap_bytes():
    try:
        return int(pltpu.get_tpu_info().vmem_capacity_bytes)
    except Exception:
        return 64 << 20        # conservative fallback: v7x per-TC VMEM


# ---------------------------------------------------------------------------
# Forward pass.
# ---------------------------------------------------------------------------
def mlp_regression_forward(x, prepared, *, max_tile_b=1024):
    """x: (B, input_dim).  prepared: output of prepare_params()."""
    B, input_dim = x.shape
    w1p, b1p = prepared["w1"], prepared["b1"]
    w2p, b2p = prepared["w2"], prepared["b2"]
    w3p, b3p = prepared["w3"], prepared["b3"]
    w4p, b4p = prepared["w4"], prepared["b4"]
    assert w1p.shape[0] == input_dim
    cdt = jnp.dtype(w1p.dtype)
    h1_p, h2_p, h3_p = w1p.shape[1], w2p.shape[1], w3p.shape[1]
    output_dim = w4p.shape[1]

    # --- batch tiling: minimal padding, big tiles ---------------------------
    sublane = 16 if cdt == jnp.bfloat16 else 8         # rows per packed vreg
    n_tiles = max(1, pl.cdiv(B, max_tile_b))
    tile_b = _round_up(pl.cdiv(B, n_tiles), sublane)
    n_tiles = pl.cdiv(B, tile_b)
    B_p = n_tiles * tile_b                              # pad <= sublane-1 rows/tile

    xp = x.astype(cdt)
    if B_p != B:
        xp = jnp.pad(xp, ((0, B_p - B), (0, 0)))

    # --- VMEM budget: no double-hedging, per-generation cap -----------------
    w_bytes = (input_dim * h1_p + h1_p * h2_p + h2_p * h3_p
               + h3_p * output_dim) * cdt.itemsize
    b_bytes = (h1_p + h2_p + h3_p + output_dim) * 4
    io_bytes = 2 * tile_b * (input_dim * cdt.itemsize + output_dim * 4)
    act_bytes = tile_b * (h1_p + h2_p + h3_p) * (4 + cdt.itemsize)
    # 2x on weights/biases keeps the hint safe even if Buffered(1) falls back.
    needed = 2 * w_bytes + 2 * b_bytes + io_bytes + act_bytes
    cap = int(0.8 * _vmem_cap_bytes())
    vmem_limit = int(min(max(needed + (4 << 20), 16 << 20), cap))

    def call(use_buffered):
        def resident(arr):
            # Whole-array block, constant index map -> fetched once and kept
            # resident across every batch tile.  Buffered(1) drops the
            # pointless second buffer for data that never changes.
            if use_buffered:
                return pl.BlockSpec(arr.shape, lambda i: (0, 0),
                                    pipeline_mode=pl.Buffered(1))
            return pl.BlockSpec(arr.shape, lambda i: (0, 0))

        return pl.pallas_call(
            mlp_kernel,
            out_shape=jax.ShapeDtypeStruct((B_p, output_dim), jnp.float32),
            grid=(n_tiles,),
            in_specs=[
                pl.BlockSpec((tile_b, input_dim), lambda i: (i, 0)),
                resident(w1p), resident(b1p),
                resident(w2p), resident(b2p),
                resident(w3p), resident(b3p),
                resident(w4p), resident(b4p),
            ],
            out_specs=pl.BlockSpec((tile_b, output_dim), lambda i: (i, 0)),
            compiler_params=pltpu.CompilerParams(
                dimension_semantics=("parallel",),
                vmem_limit_bytes=vmem_limit,
            ),
        )(xp, w1p, b1p, w2p, b2p, w3p, b3p, w4p, b4p)

    try:
        out = call(use_buffered=True)
    except Exception:
        # Older builds may reject pipeline_mode=pl.Buffered(1); the default
        # double-buffering is still correct, just uses 2x weight VMEM.
        out = call(use_buffered=False)

    return out[:B] if B_p != B else out


# ---------------------------------------------------------------------------
# Init / reference / test.
# ---------------------------------------------------------------------------
def init_params(key, input_dim, output_dim, h1, h2, h3):
    """Deterministic init mimicking nn.Linear default U(-1/sqrt(fan_in), +)."""
    dims = [(input_dim, h1), (h1, h2), (h2, h3), (h3, output_dim)]
    params = {}
    for idx, (fan_in, fan_out) in enumerate(dims, start=1):
        key, kw, kb = jax.random.split(key, 3)
        bound = 1.0 / jnp.sqrt(jnp.float32(fan_in))
        # Stored as (in, out): PyTorch's (out, in) weight, transposed.
        params[f"w{idx}"] = jax.random.uniform(
            kw, (fan_in, fan_out), jnp.float32, -bound, bound)
        params[f"b{idx}"] = jax.random.uniform(
            kb, (1, fan_out), jnp.float32, -bound, bound)
    return params


def mlp_reference(x, params):
    h = jnp.tanh(x @ params["w1"] + params["b1"])
    h = jnp.tanh(h @ params["w2"] + params["b2"])
    h = jnp.tanh(h @ params["w3"] + params["b3"])
    return h @ params["w4"] + params["b4"]


if __name__ == "__main__":
    # Small shapes consistent with MLPRegression(input_dim, output_dim, h1, h2, h3).
    batch, input_dim, output_dim = 16, 16, 4
    h1, h2, h3 = 32, 32, 32

    key = jax.random.PRNGKey(0)
    key, kx = jax.random.split(key)
    x = jax.random.normal(kx, (batch, input_dim), jnp.float32)
    params = init_params(key, input_dim, output_dim, h1, h2, h3)

    ref = mlp_reference(x, params)

    # f32 MXU-input path: exact vs the pure-JAX reference.
    prepared_f32 = prepare_params(params, compute_dtype=jnp.float32)
    out_f32 = jax.block_until_ready(mlp_regression_forward(x, prepared_f32))
    assert out_f32.shape == (batch, output_dim)
    assert jnp.allclose(out_f32, ref, atol=1e-5, rtol=1e-5), "f32 mismatch vs reference"

    # Default bf16 MXU-input path (native on v5e/v6e/v7x): f32 accumulation.
    # x is also cast to bf16 (dominant error source) -> looser tolerance.
    prepared_bf16 = prepare_params(params)  # compute_dtype=bfloat16 by default
    out_bf16 = jax.block_until_ready(mlp_regression_forward(x, prepared_bf16))
    assert out_bf16.shape == (batch, output_dim)
    assert jnp.allclose(out_bf16, ref, atol=5e-2, rtol=5e-2), "bf16 mismatch vs reference"

    print("KERNEL_OK")
</pallas_src>

<mosaic_0001>
module attributes {stable_mosaic.version = 11 : i64} {
  func.func @mlp_kernel(%arg0: i32, %arg1: memref<16x16xf32, #tpu.memory_space<vmem>>, %arg2: memref<16x128xf32, #tpu.memory_space<vmem>>, %arg3: memref<1x128xf32, #tpu.memory_space<vmem>>, %arg4: memref<128x128xf32, #tpu.memory_space<vmem>>, %arg5: memref<1x128xf32, #tpu.memory_space<vmem>>, %arg6: memref<128x128xf32, #tpu.memory_space<vmem>>, %arg7: memref<1x128xf32, #tpu.memory_space<vmem>>, %arg8: memref<128x4xf32, #tpu.memory_space<vmem>>, %arg9: memref<1x4xf32, #tpu.memory_space<vmem>>, %arg10: memref<16x4xf32, #tpu.memory_space<vmem>>) attributes {dimension_semantics = [#tpu.dimension_semantics<parallel>], iteration_bounds = array<i64: 1>, scalar_prefetch = 0 : i64, scratch_operands = 0 : i64, tpu.core_type = #tpu.core_type<tc>, window_params = [{transform_indices = @transform_0, window_bounds = array<i64: 16, 16>}, {pipeline_mode = #tpu.pipeline_mode<synchronous>, transform_indices = @transform_1, window_bounds = array<i64: 16, 128>}, {pipeline_mode = #tpu.pipeline_mode<synchronous>, transform_indices = @transform_2, window_bounds = array<i64: 1, 128>}, {pipeline_mode = #tpu.pipeline_mode<synchronous>, transform_indices = @transform_3, window_bounds = array<i64: 128, 128>}, {pipeline_mode = #tpu.pipeline_mode<synchronous>, transform_indices = @transform_4, window_bounds = array<i64: 1, 128>}, {pipeline_mode = #tpu.pipeline_mode<synchronous>, transform_indices = @transform_5, window_bounds = array<i64: 128, 128>}, {pipeline_mode = #tpu.pipeline_mode<synchronous>, transform_indices = @transform_6, window_bounds = array<i64: 1, 128>}, {pipeline_mode = #tpu.pipeline_mode<synchronous>, transform_indices = @transform_7, window_bounds = array<i64: 128, 4>}, {pipeline_mode = #tpu.pipeline_mode<synchronous>, transform_indices = @transform_8, window_bounds = array<i64: 1, 4>}, {transform_indices = @transform_9, window_bounds = array<i64: 16, 4>}]} {
    %c0 = arith.constant 0 : index
    %c0_0 = arith.constant 0 : index
    %0 = vector.load %arg1[%c0, %c0_0] : memref<16x16xf32, #tpu.memory_space<vmem>>, vector<16x16xf32>
    %c0_1 = arith.constant 0 : index
    %c0_2 = arith.constant 0 : index
    %1 = vector.load %arg2[%c0_1, %c0_2] : memref<16x128xf32, #tpu.memory_space<vmem>>, vector<16x128xf32>
    %cst = arith.constant dense<0.000000e+00> : vector<16x128xf32>
    %2 = tpu.matmul %0, %1, %cst {dimension_numbers = #tpu.dot_dimension_numbers<[1], [0], [0], [1], [0, 0, 1, 1], [], []>} : vector<16x16xf32>, vector<16x128xf32>, vector<16x128xf32> -> vector<16x128xf32>
    %c0_3 = arith.constant 0 : index
    %c0_4 = arith.constant 0 : index
    %3 = vector.load %arg3[%c0_3, %c0_4] : memref<1x128xf32, #tpu.memory_space<vmem>>, vector<1x128xf32>
    %4 = vector.broadcast %3 : vector<1x128xf32> to vector<16x128xf32>
    %5 = arith.addf %2, %4 : vector<16x128xf32>
    %6 = math.tanh %5 : vector<16x128xf32>
    %c0_5 = arith.constant 0 : index
    %c0_6 = arith.constant 0 : index
    %7 = vector.load %arg4[%c0_5, %c0_6] : memref<128x128xf32, #tpu.memory_space<vmem>>, vector<128x128xf32>
    %cst_7 = arith.constant dense<0.000000e+00> : vector<16x128xf32>
    %8 = tpu.matmul %6, %7, %cst_7 {dimension_numbers = #tpu.dot_dimension_numbers<[1], [0], [0], [1], [0, 0, 1, 1], [], []>} : vector<16x128xf32>, vector<128x128xf32>, vector<16x128xf32> -> vector<16x128xf32>
    %c0_8 = arith.constant 0 : index
    %c0_9 = arith.constant 0 : index
    %9 = vector.load %arg5[%c0_8, %c0_9] : memref<1x128xf32, #tpu.memory_space<vmem>>, vector<1x128xf32>
    %10 = vector.broadcast %9 : vector<1x128xf32> to vector<16x128xf32>
    %11 = arith.addf %8, %10 : vector<16x128xf32>
    %12 = math.tanh %11 : vector<16x128xf32>
    %c0_10 = arith.constant 0 : index
    %c0_11 = arith.constant 0 : index
    %13 = vector.load %arg6[%c0_10, %c0_11] : memref<128x128xf32, #tpu.memory_space<vmem>>, vector<128x128xf32>
    %cst_12 = arith.constant dense<0.000000e+00> : vector<16x128xf32>
    %14 = tpu.matmul %12, %13, %cst_12 {dimension_numbers = #tpu.dot_dimension_numbers<[1], [0], [0], [1], [0, 0, 1, 1], [], []>} : vector<16x128xf32>, vector<128x128xf32>, vector<16x128xf32> -> vector<16x128xf32>
    %c0_13 = arith.constant 0 : index
    %c0_14 = arith.constant 0 : index
    %15 = vector.load %arg7[%c0_13, %c0_14] : memref<1x128xf32, #tpu.memory_space<vmem>>, vector<1x128xf32>
    %16 = vector.broadcast %15 : vector<1x128xf32> to vector<16x128xf32>
    %17 = arith.addf %14, %16 : vector<16x128xf32>
    %18 = math.tanh %17 : vector<16x128xf32>
    %c0_15 = arith.constant 0 : index
    %c0_16 = arith.constant 0 : index
    %19 = vector.load %arg8[%c0_15, %c0_16] : memref<128x4xf32, #tpu.memory_space<vmem>>, vector<128x4xf32>
    %cst_17 = arith.constant dense<0.000000e+00> : vector<16x4xf32>
    %20 = tpu.matmul %18, %19, %cst_17 {dimension_numbers = #tpu.dot_dimension_numbers<[1], [0], [0], [1], [0, 0, 1, 1], [], []>} : vector<16x128xf32>, vector<128x4xf32>, vector<16x4xf32> -> vector<16x4xf32>
    %c0_18 = arith.constant 0 : index
    %c0_19 = arith.constant 0 : index
    %21 = vector.load %arg9[%c0_18, %c0_19] : memref<1x4xf32, #tpu.memory_space<vmem>>, vector<1x4xf32>
    %22 = vector.broadcast %21 : vector<1x4xf32> to vector<16x4xf32>
    %23 = arith.addf %20, %22 : vector<16x4xf32>
    %c0_20 = arith.constant 0 : index
    %c0_21 = arith.constant 0 : index
    %24 = vector.load %arg10[%c0_20, %c0_21] : memref<16x4xf32, #tpu.memory_space<vmem>>, vector<16x4xf32>
    tpu.vector_store %arg10[%c0_20, %c0_21], %23 {strides = array<i32>} : memref<16x4xf32, #tpu.memory_space<vmem>>, vector<16x4xf32>,
    return
  }
  func.func @transform_0(%arg0: i32) -> (i32, i32) {
    %c0_i32 = arith.constant 0 : i32
    %c0_i32_0 = arith.constant 0 : i32
    return %arg0, %c0_i32 : i32, i32
  }
  func.func @transform_1(%arg0: i32) -> (i32, i32) {
    %c0_i32 = arith.constant 0 : i32
    %c0_i32_0 = arith.constant 0 : i32
    %c0_i32_1 = arith.constant 0 : i32
    return %c0_i32, %c0_i32_0 : i32, i32
  }
  func.func @transform_2(%arg0: i32) -> (i32, i32) {
    %c0_i32 = arith.constant 0 : i32
    %c0_i32_0 = arith.constant 0 : i32
    %c0_i32_1 = arith.constant 0 : i32
    return %c0_i32, %c0_i32_0 : i32, i32
  }
  func.func @transform_3(%arg0: i32) -> (i32, i32) {
    %c0_i32 = arith.constant 0 : i32
    %c0_i32_0 = arith.constant 0 : i32
    %c0_i32_1 = arith.constant 0 : i32
    return %c0_i32, %c0_i32_0 : i32, i32
  }
  func.func @transform_4(%arg0: i32) -> (i32, i32) {
    %c0_i32 = arith.constant 0 : i32
    %c0_i32_0 = arith.constant 0 : i32
    %c0_i32_1 = arith.constant 0 : i32
    return %c0_i32, %c0_i32_0 : i32, i32
  }
  func.func @transform_5(%arg0: i32) -> (i32, i32) {
    %c0_i32 = arith.constant 0 : i32
    %c0_i32_0 = arith.constant 0 : i32
    %c0_i32_1 = arith.constant 0 : i32
    return %c0_i32, %c0_i32_0 : i32, i32
  }
  func.func @transform_6(%arg0: i32) -> (i32, i32) {
    %c0_i32 = arith.constant 0 : i32
    %c0_i32_0 = arith.constant 0 : i32
    %c0_i32_1 = arith.constant 0 : i32
    return %c0_i32, %c0_i32_0 : i32, i32
  }
  func.func @transform_7(%arg0: i32) -> (i32, i32) {
    %c0_i32 = arith.constant 0 : i32
    %c0_i32_0 = arith.constant 0 : i32
    %c0_i32_1 = arith.constant 0 : i32
    return %c0_i32, %c0_i32_0 : i32, i32
  }
  func.func @transform_8(%arg0: i32) -> (i32, i32) {
    %c0_i32 = arith.constant 0 : i32
    %c0_i32_0 = arith.constant 0 : i32
    %c0_i32_1 = arith.constant 0 : i32
    return %c0_i32, %c0_i32_0 : i32, i32
  }
  func.func @transform_9(%arg0: i32) -> (i32, i32) {
    %c0_i32 = arith.constant 0 : i32
    %c0_i32_0 = arith.constant 0 : i32
    return %arg0, %c0_i32 : i32, i32
  }
}

module attributes {stable_mosaic.version = 11 : i64} {
  func.func @mlp_kernel(%arg0: i32, %arg1: memref<16x16xf32, #tpu.memory_space<vmem>>, %arg2: memref<16x128xf32, #tpu.memory_space<vmem>>, %arg3: memref<1x128xf32, #tpu.memory_space<vmem>>, %arg4: memref<128x128xf32, #tpu.memory_space<vmem>>, %arg5: memref<1x128xf32, #tpu.memory_space<vmem>>, %arg6: memref<128x128xf32, #tpu.memory_space<vmem>>, %arg7: memref<1x128xf32, #tpu.memory_space<vmem>>, %arg8: memref<128x4xf32, #tpu.memory_space<vmem>>, %arg9: memref<1x4xf32, #tpu.memory_space<vmem>>, %arg10: memref<16x4xf32, #tpu.memory_space<vmem>>) attributes {dimension_semantics = [#tpu.dimension_semantics<parallel>], iteration_bounds = array<i64: 1>, scalar_prefetch = 0 : i64, scratch_operands = 0 : i64, tpu.core_type = #tpu.core_type<tc>, window_params = [{transform_indices = @transform_0, window_bounds = array<i64: 16, 16>}, {pipeline_mode = #tpu.pipeline_mode<synchronous>, transform_indices = @transform_1, window_bounds = array<i64: 16, 128>}, {pipeline_mode = #tpu.pipeline_mode<synchronous>, transform_indices = @transform_2, window_bounds = array<i64: 1, 128>}, {pipeline_mode = #tpu.pipeline_mode<synchronous>, transform_indices = @transform_3, window_bounds = array<i64: 128, 128>}, {pipeline_mode = #tpu.pipeline_mode<synchronous>, transform_indices = @transform_4, window_bounds = array<i64: 1, 128>}, {pipeline_mode = #tpu.pipeline_mode<synchronous>, transform_indices = @transform_5, window_bounds = array<i64: 128, 128>}, {pipeline_mode = #tpu.pipeline_mode<synchronous>, transform_indices = @transform_6, window_bounds = array<i64: 1, 128>}, {pipeline_mode = #tpu.pipeline_mode<synchronous>, transform_indices = @transform_7, window_bounds = array<i64: 128, 4>}, {pipeline_mode = #tpu.pipeline_mode<synchronous>, transform_indices = @transform_8, window_bounds = array<i64: 1, 4>}, {transform_indices = @transform_9, window_bounds = array<i64: 16, 4>}]} {
    %c0 = arith.constant 0 : index
    %c0_0 = arith.constant 0 : index
    %0 = vector.load %arg1[%c0, %c0_0] : memref<16x16xf32, #tpu.memory_space<vmem>>, vector<16x16xf32>
    %c0_1 = arith.constant 0 : index
    %c0_2 = arith.constant 0 : index
    %1 = vector.load %arg2[%c0_1, %c0_2] : memref<16x128xf32, #tpu.memory_space<vmem>>, vector<16x128xf32>
    %cst = arith.constant dense<0.000000e+00> : vector<16x128xf32>
    %2 = tpu.matmul %0, %1, %cst {dimension_numbers = #tpu.dot_dimension_numbers<[1], [0], [0], [1], [0, 0, 1, 1], [], []>} : vector<16x16xf32>, vector<16x128xf32>, vector<16x128xf32> -> vector<16x128xf32>
    %c0_3 = arith.constant 0 : index
    %c0_4 = arith.constant 0 : index
    %3 = vector.load %arg3[%c0_3, %c0_4] : memref<1x128xf32, #tpu.memory_space<vmem>>, vector<1x128xf32>
    %4 = vector.broadcast %3 : vector<1x128xf32> to vector<16x128xf32>
    %5 = arith.addf %2, %4 : vector<16x128xf32>
    %6 = math.tanh %5 : vector<16x128xf32>
    %c0_5 = arith.constant 0 : index
    %c0_6 = arith.constant 0 : index
    %7 = vector.load %arg4[%c0_5, %c0_6] : memref<128x128xf32, #tpu.memory_space<vmem>>, vector<128x128xf32>
    %cst_7 = arith.constant dense<0.000000e+00> : vector<16x128xf32>
    %8 = tpu.matmul %6, %7, %cst_7 {dimension_numbers = #tpu.dot_dimension_numbers<[1], [0], [0], [1], [0, 0, 1, 1], [], []>} : vector<16x128xf32>, vector<128x128xf32>, vector<16x128xf32> -> vector<16x128xf32>
    %c0_8 = arith.constant 0 : index
    %c0_9 = arith.constant 0 : index
    %9 = vector.load %arg5[%c0_8, %c0_9] : memref<1x128xf32, #tpu.memory_space<vmem>>, vector<1x128xf32>
    %10 = vector.broadcast %9 : vector<1x128xf32> to vector<16x128xf32>
    %11 = arith.addf %8, %10 : vector<16x128xf32>
    %12 = math.tanh %11 : vector<16x128xf32>
    %c0_10 = arith.constant 0 : index
    %c0_11 = arith.constant 0 : index
    %13 = vector.load %arg6[%c0_10, %c0_11] : memref<128x128xf32, #tpu.memory_space<vmem>>, vector<128x128xf32>
    %cst_12 = arith.constant dense<0.000000e+00> : vector<16x128xf32>
    %14 = tpu.matmul %12, %13, %cst_12 {dimension_numbers = #tpu.dot_dimension_numbers<[1], [0], [0], [1], [0, 0, 1, 1], [], []>} : vector<16x128xf32>, vector<128x128xf32>, vector<16x128xf32> -> vector<16x128xf32>
    %c0_13 = arith.constant 0 : index
    %c0_14 = arith.constant 0 : index
    %15 = vector.load %arg7[%c0_13, %c0_14] : memref<1x128xf32, #tpu.memory_space<vmem>>, vector<1x128xf32>
    %16 = vector.broadcast %15 : vector<1x128xf32> to vector<16x128xf32>
    %17 = arith.addf %14, %16 : vector<16x128xf32>
    %18 = math.tanh %17 : vector<16x128xf32>
    %c0_15 = arith.constant 0 : index
    %c0_16 = arith.constant 0 : index
    %19 = vector.load %arg8[%c0_15, %c0_16] : memref<128x4xf32, #tpu.memory_space<vmem>>, vector<128x4xf32>
    %cst_17 = arith.constant dense<0.000000e+00> : vector<16x4xf32>
    %20 = tpu.matmul %18, %19, %cst_17 {dimension_numbers = #tpu.dot_dimension_numbers<[1], [0], [0], [1], [0, 0, 1, 1], [], []>} : vector<16x128xf32>, vector<128x4xf32>, vector<16x4xf32> -> vector<16x4xf32>
    %c0_18 = arith.constant 0 : index
    %c0_19 = arith.constant 0 : index
    %21 = vector.load %arg9[%c0_18, %c0_19] : memref<1x4xf32, #tpu.memory_space<vmem>>, vector<1x4xf32>
    %22 = vector.broadcast %21 : vector<1x4xf32> to vector<16x4xf32>
    %23 = arith.addf %20, %22 : vector<16x4xf32>
    %c0_20 = arith.constant 0 : index
    %c0_21 = arith.constant 0 : index
    %24 = vector.load %arg10[%c0_20, %c0_21] : memref<16x4xf32, #tpu.memory_space<vmem>>, vector<16x4xf32>
    tpu.vector_store %arg10[%c0_20, %c0_21], %23 {strides = array<i32>} : memref<16x4xf32, #tpu.memory_space<vmem>>, vector<16x4xf32>,
    return
  }
  func.func @transform_0(%arg0: i32) -> (i32, i32) {
    %c0_i32 = arith.constant 0 : i32
    %c0_i32_0 = arith.constant 0 : i32
    return %arg0, %c0_i32 : i32, i32
  }
  func.func @transform_1(%arg0: i32) -> (i32, i32) {
    %c0_i32 = arith.constant 0 : i32
    %c0_i32_0 = arith.constant 0 : i32
    %c0_i32_1 = arith.constant 0 : i32
    return %c0_i32, %c0_i32_0 : i32, i32
  }
  func.func @transform_2(%arg0: i32) -> (i32, i32) {
    %c0_i32 = arith.constant 0 : i32
    %c0_i32_0 = arith.constant 0 : i32
    %c0_i32_1 = arith.constant 0 : i32
    return %c0_i32, %c0_i32_0 : i32, i32
  }
  func.func @transform_3(%arg0: i32) -> (i32, i32) {
    %c0_i32 = arith.constant 0 : i32
    %c0_i32_0 = arith.constant 0 : i32
    %c0_i32_1 = arith.constant 0 : i32
    return %c0_i32, %c0_i32_0 : i32, i32
  }
  func.func @transform_4(%arg0: i32) -> (i32, i32) {
    %c0_i32 = arith.constant 0 : i32
    %c0_i32_0 = arith.constant 0 : i32
    %c0_i32_1 = arith.constant 0 : i32
    return %c0_i32, %c0_i32_0 : i32, i32
  }
  func.func @transform_5(%arg0: i32) -> (i32, i32) {
    %c0_i32 = arith.constant 0 : i32
    %c0_i32_0 = arith.constant 0 : i32
    %c0_i32_1 = arith.constant 0 : i32
    return %c0_i32, %c0_i32_0 : i32, i32
  }
  func.func @transform_6(%arg0: i32) -> (i32, i32) {
    %c0_i32 = arith.constant 0 : i32
    %c0_i32_0 = arith.constant 0 : i32
    %c0_i32_1 = arith.constant 0 : i32
    return %c0_i32, %c0_i32_0 : i32, i32
  }
  func.func @transform_7(%arg0: i32) -> (i32, i32) {
    %c0_i32 = arith.constant 0 : i32
    %c0_i32_0 = arith.constant 0 : i32
    %c0_i32_1 = arith.constant 0 : i32
    return %c0_i32, %c0_i32_0 : i32, i32
  }
  func.func @transform_8(%arg0: i32) -> (i32, i32) {
    %c0_i32 = arith.constant 0 : i32
    %c0_i32_0 = arith.constant 0 : i32
    %c0_i32_1 = arith.constant 0 : i32
    return %c0_i32, %c0_i32_0 : i32, i32
  }
  func.func @transform_9(%arg0: i32) -> (i32, i32) {
    %c0_i32 = arith.constant 0 : i32
    %c0_i32_0 = arith.constant 0 : i32
    return %arg0, %c0_i32 : i32, i32
  }
}

</mosaic_0001>

<bundles_post_ra>
// kernel: tpu_custom_call.1
= control target key start
LH: loop header
LB: loop body
LE: loop exit
PB: predicated region body
PF: predicated region fallthrough
CT: control target
= control target key end

     0   :  { %14 = vsyncpa [#allocation3], 0  ;;  %s1061_s0 = inlined_call_operand.hbm [shape: f32[16,16], index: 0, kind: input, shape index: {}]   ;;  %s1062_s1 = inlined_call_operand.hbm [shape: f32[16,128], index: 1, kind: input, shape index: {}]   ;;  %s1063_s2 = inlined_call_operand.vmem [shape: f32[1,128], index: 2, kind: input, shape index: {}]   ;;  %s1064_s3 = inlined_call_operand.vmem [shape: f32[128,128], index: 3, kind: input, shape index: {}]   ;;  %s1065_s4 = inlined_call_operand.vmem [shape: f32[1,128], index: 4, kind: input, shape index: {}]   ;;  %s1066_s5 = inlined_call_operand.hbm [shape: f32[128,128], index: 5, kind: input, shape index: {}]   ;;  %s1067_s6 = inlined_call_operand.vmem [shape: f32[1,128], index: 6, kind: input, shape index: {}]   ;;  %s1068_s7 = inlined_call_operand.vmem [shape: f32[128,4], index: 7, kind: input, shape index: {}]   ;;  %s1069_s8 = inlined_call_operand.vmem [shape: f32[1,4], index: 8, kind: input, shape index: {}]   ;;  %s1070_s9 = inlined_call_operand.vmem [shape: f32[16,4], index: 9, kind: output, shape index: {}]  }
   0x1   :  { %15 = vsyncpa [#allocation5], 0  ;;  %s838_s30 = smov [#allocation4]   ;;  %s839_s11 = smov [#allocation2]  }
   0x2   :  { %s33_s10 = sshll.u32 %s838_s30, 4  ;;  %s21_s12 = sshll.u32 %s839_s11, 4  ;;  %s34_s10 = int_to_ptr.vmem [resolvable:$true] %s33_s10  ;;  %s893_s12 = int_to_ptr.vmem [resolvable:$true] %s21_s12 }
   0x3   :  { %s768_s15 = scalar_lea.hbm %s1062_s1, 256 }
   0x4   :  { %p769_p0 = scmp.ne.s32.totalorder %s1062_s1, %s768_s15  ;;  %p772_p1 = scmp.lt.u32.totalorder %s768_s15, %s1062_s1 }
   0x6   :  { %p774_p2 = pnand %p772_p1, %p769_p0 }
   0x8   :  { %777 = shalt.err (!%p774_p2)
}
   0x9   :  { %s778_s20 = scalar_lea.vmem %s34_s10, 256  ;;  %p783_p4 = scmp.lt.s32.totalorder %s34_s10, %s34_s10 }
   0xa   :  { %p779_p3 = scmp.ne.s32.totalorder %s34_s10, %s778_s20  ;;  %p784_p5 = scmp.lt.s32.totalorder %s778_s20, %s778_s20 }
   0xc   :  { %p785_p6 = por %p784_p5, %p783_p4 }
   0xe   :  { %p786_p7 = pnand %p785_p6, %p779_p3 }
  0x10   :  { %789 = shalt.err (!%p786_p7)
}
  0x11   :  { %s840_s21 = smov 128   ;;  %s841_s22 = smov 8  }
  0x12   :  { %39 = dma.hbm_to_vmem [thread:$0]  %s1062_s1, 256, %s34_s10, [#allocation5], %s840_s21, %s840_s21, %s841_s22  }
  0x13   :  { %s790_s27 = scalar_lea.hbm %s1061_s0, 256 }
  0x14   :  { %p791_p8 = scmp.ne.s32.totalorder %s1061_s0, %s790_s27  ;;  %p794_p9 = scmp.lt.u32.totalorder %s790_s27, %s1061_s0 }
  0x16   :  { %p796_p10 = pnand %p794_p9, %p791_p8 }
  0x18   :  { %799 = shalt.err (!%p796_p10)
}
  0x19   :  { %s800_s13 = scalar_lea.vmem %s893_s12, 256  ;;  %p805_p12 = scmp.lt.s32.totalorder %s893_s12, %s893_s12 }
  0x1a   :  { %p801_p11 = scmp.ne.s32.totalorder %s893_s12, %s800_s13  ;;  %p806_p13 = scmp.lt.s32.totalorder %s800_s13, %s800_s13 }
  0x1c   :  { %p807_p0 = por %p806_p13, %p805_p12 }
  0x1e   :  { %p808_p1 = pnand %p807_p0, %p801_p11 }
  0x20   :  { %811 = shalt.err (!%p808_p1)
}
  0x21   :  { %27 = dma.hbm_to_vmem [thread:$0]  %s1061_s0, 256, %s893_s12, [#allocation3], %s840_s21, %s840_s21, %s841_s22  }
  0x22   :  { %s842_s14 = smov [#allocation6]   ;;  %s812_s18 = scalar_lea.hbm %s1066_s5, 2048 }
  0x23   :  { %s51_s15 = sshll.u32 %s842_s14, 4  ;;  %p813_p2 = scmp.ne.s32.totalorder %s1066_s5, %s812_s18  ;;  %s52_s15 = int_to_ptr.vmem [resolvable:$true] %s51_s15 }
  0x24   :  { %p816_p3 = scmp.lt.u32.totalorder %s812_s18, %s1066_s5 }
  0x26   :  { %p818_p4 = pnand %p816_p3, %p813_p2 }
  0x28   :  { %821 = shalt.err (!%p818_p4)
}
  0x29   :  { %s822_s25 = scalar_lea.vmem %s52_s15, 2048  ;;  %p827_p6 = scmp.lt.s32.totalorder %s52_s15, %s52_s15 }
  0x2a   :  { %p823_p5 = scmp.ne.s32.totalorder %s52_s15, %s822_s25  ;;  %p828_p7 = scmp.lt.s32.totalorder %s822_s25, %s822_s25 }
  0x2c   :  { %p829_p8 = por %p828_p7, %p827_p6 }
  0x2e   :  { %p830_p9 = pnand %p829_p8, %p823_p5 }
  0x30   :  { %833 = shalt.err (!%p830_p9)
}
  0x31   :  { %57 = dma.hbm_to_vmem [thread:$0]  %s1066_s5, 2048, %s52_s15, [#allocation5], %s840_s21, %s840_s21, %s841_s22  }
  0x32   :  { %834 = dma.done.wait [#allocation3], 256  }
  0x33   :  { %835 = vsyncadd [#allocation3], 4294967040 }
  0x34   :  { %836 = dma.done.wait [#allocation5], 2304  }
  0x35   :  { %837 = vsyncadd [#allocation5], 4294964992  ;;  %vm84_vm0 = vcmask 130048   ;;  %v75_v0 = vld [vmem:[#allocation4] sm:$0xff]  ;;  %v76_v1 = vld [vmem:[#allocation4 + $0x8] sm:$0xff]  ;;  %vm466_vm1 = vcmask 31744  }
  0x36   :  { %v73_v2 = vld [vmem:[#allocation2] sm:$0xff]  ;;  %v651_v3 = vpack.c.bf16 %v76_v1, %v75_v0  ;;  %v169_v5 = vld [vmem:[%s1064_s3 + $0x8] sm:$0xff]  ;;  %v170_v7 = vld [vmem:[%s1064_s3 + $0x10] sm:$0xff] }
  0x37   :  { %543 = vmatprep.mubr.msk.f32.mxu0 %vm84_vm0, %v73_v2  ;;  %v168_v4 = vld [vmem:[%s1064_s3] sm:$0xff]  ;;  %v171_v8 = vld [vmem:[%s1064_s3 + $0x18] sm:$0xff]  ;;  %v173_v11 = vld [vmem:[%s1064_s3 + $0x28] sm:$0xff] }
  0x38   :  { %v655_v6 = vpack.c.bf16 %v169_v5, %v168_v4  ;;  %652 = vmatprep.subr.bf16.mxu0 %v651_v3  ;;  %v659_v9 = vpack.c.bf16 %v171_v8, %v170_v7  ;;  %v172_v10 = vld [vmem:[%s1064_s3 + $0x20] sm:$0xff]  ;;  %v74_v12 = vld [vmem:[#allocation2 + $0x8] sm:$0xff]  ;;  %v174_v14 = vld [vmem:[%s1064_s3 + $0x30] sm:$0xff] }
  0x39   :  { %654 = vmatpush3.bf16.msra.mxu0 %v651_v3  ;;  %v663_v13 = vpack.c.bf16 %v173_v11, %v172_v10  ;;  %v175_v15 = vld [vmem:[%s1064_s3 + $0x38] sm:$0xff]  ;;  %v176_v17 = vld [vmem:[%s1064_s3 + $0x40] sm:$0xff]  ;;  %v177_v18 = vld [vmem:[%s1064_s3 + $0x48] sm:$0xff] }
  0x3a   :  { %656 = vmatprep.subr.bf16.mxu1 %v655_v6  ;;  %v667_v16 = vpack.c.bf16 %v175_v15, %v174_v14  ;;  %v671_v19 = vpack.c.bf16 %v177_v18, %v176_v17  ;;  %v178_v20 = vld [vmem:[%s1064_s3 + $0x50] sm:$0xff]  ;;  %v179_v21 = vld [vmem:[%s1064_s3 + $0x58] sm:$0xff]  ;;  %v180_v23 = vld [vmem:[%s1064_s3 + $0x60] sm:$0xff] }
  0x3b   :  { %658 = vmatpush3.bf16.msra.mxu1 %v655_v6  ;;  %v675_v22 = vpack.c.bf16 %v179_v21, %v178_v20  ;;  %v181_v24 = vld [vmem:[%s1064_s3 + $0x68] sm:$0xff]  ;;  %v182_v25 = vld [vmem:[%s1064_s3 + $0x70] sm:$0xff]  ;;  %v183_v27 = vld [vmem:[%s1064_s3 + $0x78] sm:$0xff] }
  0x3c   :  { %660 = vmatprep.subr.bf16.mxu1 %v659_v9  ;;  %544 = vmatmul.mubr.msk.f32.vlgmr.msra.gmra.mrb[0].mxu0 %vm84_vm0, %v74_v12  ;;  %v679_v26 = vpack.c.bf16 %v181_v24, %v180_v23  ;;  %v683_v28 = vpack.c.bf16 %v183_v27, %v182_v25  ;;  %v268_v29 = vld [vmem:[#allocation6] sm:$0xff]  ;;  %v269_v30 = vld [vmem:[#allocation6 + $0x8] sm:$0xff]  ;;  %v270_v31 = vld [vmem:[#allocation6 + $0x10] sm:$0xff] }
  0x3d   :  { %v687_v32 = vpack.c.bf16 %v269_v30, %v268_v29  ;;  %v271_v33 = vld [vmem:[#allocation6 + $0x18] sm:$0xff]  ;;  %v272_v35 = vld [vmem:[#allocation6 + $0x20] sm:$0xff]  ;;  %v273_v36 = vld [vmem:[#allocation6 + $0x28] sm:$0xff] }
  0x3e   :  { %v691_v34 = vpack.c.bf16 %v271_v33, %v270_v31  ;;  %v695_v37 = vpack.c.bf16 %v273_v36, %v272_v35  ;;  %v274_v38 = vld [vmem:[#allocation6 + $0x30] sm:$0xff]  ;;  %v275_v39 = vld [vmem:[#allocation6 + $0x38] sm:$0xff]  ;;  %v475_v41 = vld [vmem:[%s1063_s2] ss:$0 sm:$0xff] }
  0x3f   :  { %662 = vmatpush3.bf16.msra.mxu1 %v659_v9  ;;  %688 = vmatprep.subr.bf16.mxu0 %v687_v32  ;;  %v699_v40 = vpack.c.bf16 %v275_v39, %v274_v38  ;;  %v276_v48 = vld [vmem:[#allocation6 + $0x40] sm:$0xff]  ;;  %v277_v49 = vld [vmem:[#allocation6 + $0x48] sm:$0xff]  ;;  %v278_v51 = vld [vmem:[#allocation6 + $0x50] sm:$0xff] }
  0x40   :  { %664 = vmatprep.subr.bf16.mxu1 %v663_v13  ;;  %690 = vmatpush3.bf16.msra.mxu0 %v687_v32  ;;  %v703_v50 = vpack.c.bf16 %v277_v49, %v276_v48  ;;  %v279_v52 = vld [vmem:[#allocation6 + $0x58] sm:$0xff]  ;;  %v280_v54 = vld [vmem:[#allocation6 + $0x60] sm:$0xff]  ;;  %v281_v55 = vld [vmem:[#allocation6 + $0x68] sm:$0xff] }
  0x41   :  { %692 = vmatprep.subr.bf16.mxu0 %v691_v34  ;;  %v707_v53 = vpack.c.bf16 %v279_v52, %v278_v51  ;;  %v282_v56 = vld [vmem:[#allocation6 + $0x70] sm:$0xff]  ;;  %v711_v57 = vpack.c.bf16 %v281_v55, %v280_v54  ;;  %v283_v58 = vld [vmem:[#allocation6 + $0x78] sm:$0xff]  ;;  %v368_v60 = vld [vmem:[%s1068_s7] sm:$0xff] }
  0x42   :  { %v715_v59 = vpack.c.bf16 %v283_v58, %v282_v56  ;;  %v369_v61 = vld [vmem:[%s1068_s7 + $0x8] sm:$0xff]  ;;  %v370_v62 = vld [vmem:[%s1068_s7 + $0x10] sm:$0xff]  ;;  %v371_v0 = vld [vmem:[%s1068_s7 + $0x18] sm:$0xff] }
  0x43   :  { %666 = vmatpush3.bf16.msra.mxu1 %v663_v13  ;;  %v719_v63 = vpack.c.bf16 %v369_v61, %v368_v60  ;;  %v723_v1 = vpack.c.bf16 %v371_v0, %v370_v62  ;;  %v372_v2 = vld [vmem:[%s1068_s7 + $0x20] sm:$0xff]  ;;  %v373_v3 = vld [vmem:[%s1068_s7 + $0x28] sm:$0xff]  ;;  %v374_v5 = vld [vmem:[%s1068_s7 + $0x30] sm:$0xff] }
  0x44   :  { %668 = vmatprep.subr.bf16.mxu1 %v667_v16  ;;  %694 = vmatpush3.bf16.msra.mxu0 %v691_v34  ;;  %v727_v4 = vpack.c.bf16 %v373_v3, %v372_v2  ;;  %v375_v6 = vld [vmem:[%s1068_s7 + $0x38] sm:$0xff]  ;;  %v478_v8 = vld [vmem:[%s1065_s4] ss:$0 sm:$0xff]  ;;  %v378_v18 = vld [vmem:[%s1068_s7 + $0x50] sm:$0xff] }
  0x45   :  { %696 = vmatprep.subr.bf16.mxu0 %v695_v37  ;;  %v731_v7 = vpack.c.bf16 %v375_v6, %v374_v5  ;;  %v376_v15 = vld [vmem:[%s1068_s7 + $0x40] sm:$0xff]  ;;  %v382_v23 = vld [vmem:[%s1068_s7 + $0x70] sm:$0xff]  ;;  %v383_v25 = vld [vmem:[%s1068_s7 + $0x78] sm:$0xff] }
  0x46   :  { %v380_v21 = vld [vmem:[%s1068_s7 + $0x60] sm:$0xff] }
  0x47   :  { %670 = vmatpush3.bf16.msra.mxu1 %v667_v16  ;;  %v377_v16 = vld [vmem:[%s1068_s7 + $0x48] sm:$0xff]  ;;  %v479_v27 = vld [vmem:[%s1067_s6] ss:$0 sm:$0xff] }
  0x48   :  { %672 = vmatprep.subr.bf16.mxu1 %v671_v19  ;;  %698 = vmatpush3.bf16.msra.mxu0 %v695_v37  ;;  %v735_v17 = vpack.c.bf16 %v377_v16, %v376_v15  ;;  %v480_v34 = vld [vmem:[%s1069_s8] ss:$0 sm:$0xff] }
  0x49   :  { %700 = vmatprep.subr.bf16.mxu0 %v699_v40 }
  0x4b   :  { %674 = vmatpush3.bf16.msra.mxu1 %v671_v19  ;;  %v379_v19 = vld [vmem:[%s1068_s7 + $0x58] sm:$0xff] }
  0x4c   :  { %676 = vmatprep.subr.bf16.mxu1 %v675_v22  ;;  %702 = vmatpush3.bf16.msra.mxu0 %v699_v40  ;;  %v739_v20 = vpack.c.bf16 %v379_v19, %v378_v18 }
  0x4d   :  { %704 = vmatprep.subr.bf16.mxu0 %v703_v50 }
  0x4f   :  { %678 = vmatpush3.bf16.msra.mxu1 %v675_v22  ;;  %v381_v22 = vld [vmem:[%s1068_s7 + $0x68] sm:$0xff] }
  0x50   :  { %680 = vmatprep.subr.bf16.mxu1 %v679_v26  ;;  %706 = vmatpush3.bf16.msra.mxu0 %v703_v50  ;;  %v743_v24 = vpack.c.bf16 %v381_v22, %v380_v21 }
  0x51   :  { %708 = vmatprep.subr.bf16.mxu0 %v707_v53 }
  0x53   :  { %682 = vmatpush3.bf16.msra.mxu1 %v679_v26  ;;  %v747_v26 = vpack.c.bf16 %v383_v25, %v382_v23 }
  0x54   :  { %684 = vmatprep.subr.bf16.mxu1 %v683_v28  ;;  %710 = vmatpush3.bf16.msra.mxu0 %v707_v53 }
  0x55   :  { %712 = vmatprep.subr.bf16.mxu0 %v711_v57 }
  0x57   :  { %686 = vmatpush3.bf16.msra.mxu1 %v683_v28 }
  0x58   :  { %714 = vmatpush3.bf16.msra.mxu0 %v711_v57  ;;  %720 = vmatprep.subr.bf16.mxu1 %v719_v63 }
  0x59   :  { %716 = vmatprep.subr.bf16.mxu0 %v715_v59 }
  0x5c   :  { %718 = vmatpush3.bf16.msra.mxu0 %v715_v59 }
 0x10f   :  { %v545_v42 = vpop.f32.mrb[0].mxu0 }
 0x110   :  { %v163_v43 = vadd.f32 %v545_v42, %v475_v41  ;;  %v157_v44 = vpop.f32.mrb[1].mxu0 }
 0x111   :  { %v158_v45 = vadd.f32 %v475_v41, %v157_v44 }
 0x113   :  { %756 = vtanh.f32 %v158_v45 }
 0x114   :  { %758 = vtanh.f32 %v163_v43 }
 0x11d   :  { %v757_v46 = vpop.eup %756 }
 0x11e   :  { %v759_v47 = vpop.eup %758  ;;  %578 = vmatprep.mubr.f32.mxu1 %v757_v46 }
 0x11f   :  { %579 = vmatmul.mubr.f32.vlgmr.msra.gmra.mrb[0].mxu1 %v759_v47 }
 0x120   :  { %722 = vmatpush3.bf16.msra.mxu1 %v719_v63 }
 0x121   :  { %724 = vmatprep.subr.bf16.mxu1 %v723_v1 }
 0x124   :  { %726 = vmatpush3.bf16.msra.mxu1 %v723_v1 }
 0x125   :  { %728 = vmatprep.subr.bf16.mxu1 %v727_v4 }
 0x128   :  { %730 = vmatpush3.bf16.msra.mxu1 %v727_v4 }
 0x129   :  { %732 = vmatprep.subr.bf16.mxu1 %v731_v7 }
 0x12c   :  { %734 = vmatpush3.bf16.msra.mxu1 %v731_v7 }
 0x12d   :  { %736 = vmatprep.subr.bf16.mxu1 %v735_v17 }
 0x130   :  { %738 = vmatpush3.bf16.msra.mxu1 %v735_v17 }
 0x131   :  { %740 = vmatprep.subr.bf16.mxu1 %v739_v20 }
 0x134   :  { %742 = vmatpush3.bf16.msra.mxu1 %v739_v20 }
 0x135   :  { %744 = vmatprep.subr.bf16.mxu1 %v743_v24 }
 0x138   :  { %746 = vmatpush3.bf16.msra.mxu1 %v743_v24 }
 0x139   :  { %748 = vmatprep.subr.bf16.mxu1 %v747_v26 }
 0x13c   :  { %750 = vmatpush3.bf16.msra.mxu1 %v747_v26 }
 0x1f2   :  { %v580_v9 = vpop.f32.mrb[0].mxu1 }
 0x1f3   :  { %v263_v10 = vadd.f32 %v580_v9, %v478_v8  ;;  %v257_v11 = vpop.f32.mrb[1].mxu1 }
 0x1f4   :  { %v258_v12 = vadd.f32 %v478_v8, %v257_v11 }
 0x1f6   :  { %760 = vtanh.f32 %v258_v12 }
 0x1f7   :  { %762 = vtanh.f32 %v263_v10 }
 0x200   :  { %v761_v13 = vpop.eup %760 }
 0x201   :  { %v763_v14 = vpop.eup %762  ;;  %613 = vmatprep.mubr.f32.mxu0 %v761_v13 }
 0x202   :  { %614 = vmatmul.mubr.f32.vlgmr.msra.gmra.mrb[2].mxu0 %v763_v14 }
 0x2d5   :  { %v615_v28 = vpop.f32.mrb[2].mxu0 }
 0x2d6   :  { %v363_v29 = vadd.f32 %v615_v28, %v479_v27  ;;  %v357_v30 = vpop.f32.mrb[3].mxu0 }
 0x2d7   :  { %v358_v31 = vadd.f32 %v479_v27, %v357_v30 }
 0x2d9   :  { %764 = vtanh.f32 %v358_v31 }
 0x2da   :  { %766 = vtanh.f32 %v363_v29 }
 0x2e3   :  { %v765_v32 = vpop.eup %764 }
 0x2e4   :  { %v767_v33 = vpop.eup %766  ;;  %648 = vmatprep.mubr.f32.mxu1 %v765_v32 }
 0x2e5   :  { %649 = vmatmul.mubr.f32.vlgmr.msra.gmra.mrb[2].mxu1 %v767_v33 }
 0x3b8   :  { %v650_v35 = vpop.f32.mrb[2].mxu1 }
 0x3b9   :  { %v463_v36 = vadd.f32 %v650_v35, %v480_v34  ;;  %v457_v37 = vpop.f32.mrb[3].mxu1 }
 0x3ba   :  { %v458_v38 = vadd.f32 %v480_v34, %v457_v37 }
 0x3bb   :  { %468 = vst.msk [vmem:[%s1070_s9 + $0x8] sm:$0xff] %vm466_vm1, %v463_v36 }
 0x3bc   :  { %467 = vst.msk [vmem:[%s1070_s9] sm:$0xff] %vm466_vm1, %v458_v38 }
 0x3bd   :  { %473 = vsyncpa [#allocation3], 1 }
 0x3be   :  { %474 = vsyncpa [#allocation5], 1 }

// kernel: tpu_custom_call.1
= control target key start
LH: loop header
LB: loop body
LE: loop exit
PB: predicated region body
PF: predicated region fallthrough
CT: control target
= control target key end

     0   :  { %14 = vsyncpa [#allocation3], 0  ;;  %s1061_s0 = inlined_call_operand.hbm [shape: f32[16,16], index: 0, kind: input, shape index: {}]   ;;  %s1062_s1 = inlined_call_operand.hbm [shape: f32[16,128], index: 1, kind: input, shape index: {}]   ;;  %s1063_s2 = inlined_call_operand.vmem [shape: f32[1,128], index: 2, kind: input, shape index: {}]   ;;  %s1064_s3 = inlined_call_operand.vmem [shape: f32[128,128], index: 3, kind: input, shape index: {}]   ;;  %s1065_s4 = inlined_call_operand.vmem [shape: f32[1,128], index: 4, kind: input, shape index: {}]   ;;  %s1066_s5 = inlined_call_operand.hbm [shape: f32[128,128], index: 5, kind: input, shape index: {}]   ;;  %s1067_s6 = inlined_call_operand.vmem [shape: f32[1,128], index: 6, kind: input, shape index: {}]   ;;  %s1068_s7 = inlined_call_operand.vmem [shape: f32[128,4], index: 7, kind: input, shape index: {}]   ;;  %s1069_s8 = inlined_call_operand.vmem [shape: f32[1,4], index: 8, kind: input, shape index: {}]   ;;  %s1070_s9 = inlined_call_operand.vmem [shape: f32[16,4], index: 9, kind: output, shape index: {}]  }
   0x1   :  { %15 = vsyncpa [#allocation5], 0  ;;  %s838_s30 = smov [#allocation4]   ;;  %s839_s11 = smov [#allocation2]  }
   0x2   :  { %s33_s10 = sshll.u32 %s838_s30, 4  ;;  %s21_s12 = sshll.u32 %s839_s11, 4  ;;  %s34_s10 = int_to_ptr.vmem [resolvable:$true] %s33_s10  ;;  %s893_s12 = int_to_ptr.vmem [resolvable:$true] %s21_s12 }
   0x3   :  { %s768_s15 = scalar_lea.hbm %s1062_s1, 256 }
   0x4   :  { %p769_p0 = scmp.ne.s32.totalorder %s1062_s1, %s768_s15  ;;  %p772_p1 = scmp.lt.u32.totalorder %s768_s15, %s1062_s1 }
   0x6   :  { %p774_p2 = pnand %p772_p1, %p769_p0 }
   0x8   :  { %777 = shalt.err (!%p774_p2)
}
   0x9   :  { %s778_s20 = scalar_lea.vmem %s34_s10, 256  ;;  %p783_p4 = scmp.lt.s32.totalorder %s34_s10, %s34_s10 }
   0xa   :  { %p779_p3 = scmp.ne.s32.totalorder %s34_s10, %s778_s20  ;;  %p784_p5 = scmp.lt.s32.totalorder %s778_s20, %s778_s20 }
   0xc   :  { %p785_p6 = por %p784_p5, %p783_p4 }
   0xe   :  { %p786_p7 = pnand %p785_p6, %p779_p3 }
  0x10   :  { %789 = shalt.err (!%p786_p7)
}
  0x11   :  { %s840_s21 = smov 128   ;;  %s841_s22 = smov 8  }
  0x12   :  { %39 = dma.hbm_to_vmem [thread:$0]  %s1062_s1, 256, %s34_s10, [#allocation5], %s840_s21, %s840_s21, %s841_s22  }
  0x13   :  { %s790_s27 = scalar_lea.hbm %s1061_s0, 256 }
  0x14   :  { %p791_p8 = scmp.ne.s32.totalorder %s1061_s0, %s790_s27  ;;  %p794_p9 = scmp.lt.u32.totalorder %s790_s27, %s1061_s0 }
  0x16   :  { %p796_p10 = pnand %p794_p9, %p791_p8 }
  0x18   :  { %799 = shalt.err (!%p796_p10)
}
  0x19   :  { %s800_s13 = scalar_lea.vmem %s893_s12, 256  ;;  %p805_p12 = scmp.lt.s32.totalorder %s893_s12, %s893_s12 }
  0x1a   :  { %p801_p11 = scmp.ne.s32.totalorder %s893_s12, %s800_s13  ;;  %p806_p13 = scmp.lt.s32.totalorder %s800_s13, %s800_s13 }
  0x1c   :  { %p807_p0 = por %p806_p13, %p805_p12 }
  0x1e   :  { %p808_p1 = pnand %p807_p0, %p801_p11 }
  0x20   :  { %811 = shalt.err (!%p808_p1)
}
  0x21   :  { %27 = dma.hbm_to_vmem [thread:$0]  %s1061_s0, 256, %s893_s12, [#allocation3], %s840_s21, %s840_s21, %s841_s22  }
  0x22   :  { %s842_s14 = smov [#allocation6]   ;;  %s812_s18 = scalar_lea.hbm %s1066_s5, 2048 }
  0x23   :  { %s51_s15 = sshll.u32 %s842_s14, 4  ;;  %p813_p2 = scmp.ne.s32.totalorder %s1066_s5, %s812_s18  ;;  %s52_s15 = int_to_ptr.vmem [resolvable:$true] %s51_s15 }
  0x24   :  { %p816_p3 = scmp.lt.u32.totalorder %s812_s18, %s1066_s5 }
  0x26   :  { %p818_p4 = pnand %p816_p3, %p813_p2 }
  0x28   :  { %821 = shalt.err (!%p818_p4)
}
  0x29   :  { %s822_s25 = scalar_lea.vmem %s52_s15, 2048  ;;  %p827_p6 = scmp.lt.s32.totalorder %s52_s15, %s52_s15 }
  0x2a   :  { %p823_p5 = scmp.ne.s32.totalorder %s52_s15, %s822_s25  ;;  %p828_p7 = scmp.lt.s32.totalorder %s822_s25, %s822_s25 }
  0x2c   :  { %p829_p8 = por %p828_p7, %p827_p6 }
  0x2e   :  { %p830_p9 = pnand %p829_p8, %p823_p5 }
  0x30   :  { %833 = shalt.err (!%p830_p9)
}
  0x31   :  { %57 = dma.hbm_to_vmem [thread:$0]  %s1066_s5, 2048, %s52_s15, [#allocation5], %s840_s21, %s840_s21, %s841_s22  }
  0x32   :  { %834 = dma.done.wait [#allocation3], 256  }
  0x33   :  { %835 = vsyncadd [#allocation3], 4294967040 }
  0x34   :  { %836 = dma.done.wait [#allocation5], 2304  }
  0x35   :  { %837 = vsyncadd [#allocation5], 4294964992  ;;  %vm84_vm0 = vcmask 130048   ;;  %v75_v0 = vld [vmem:[#allocation4] sm:$0xff]  ;;  %v76_v1 = vld [vmem:[#allocation4 + $0x8] sm:$0xff]  ;;  %vm466_vm1 = vcmask 31744  }
  0x36   :  { %v73_v2 = vld [vmem:[#allocation2] sm:$0xff]  ;;  %v651_v3 = vpack.c.bf16 %v76_v1, %v75_v0  ;;  %v169_v5 = vld [vmem:[%s1064_s3 + $0x8] sm:$0xff]  ;;  %v170_v7 = vld [vmem:[%s1064_s3 + $0x10] sm:$0xff] }
  0x37   :  { %543 = vmatprep.mubr.msk.f32.mxu0 %vm84_vm0, %v73_v2  ;;  %v168_v4 = vld [vmem:[%s1064_s3] sm:$0xff]  ;;  %v171_v8 = vld [vmem:[%s1064_s3 + $0x18] sm:$0xff]  ;;  %v173_v11 = vld [vmem:[%s1064_s3 + $0x28] sm:$0xff] }
  0x38   :  { %v655_v6 = vpack.c.bf16 %v169_v5, %v168_v4  ;;  %652 = vmatprep.subr.bf16.mxu0 %v651_v3  ;;  %v659_v9 = vpack.c.bf16 %v171_v8, %v170_v7  ;;  %v172_v10 = vld [vmem:[%s1064_s3 + $0x20] sm:$0xff]  ;;  %v74_v12 = vld [vmem:[#allocation2 + $0x8] sm:$0xff]  ;;  %v174_v14 = vld [vmem:[%s1064_s3 + $0x30] sm:$0xff] }
  0x39   :  { %654 = vmatpush3.bf16.msra.mxu0 %v651_v3  ;;  %v663_v13 = vpack.c.bf16 %v173_v11, %v172_v10  ;;  %v175_v15 = vld [vmem:[%s1064_s3 + $0x38] sm:$0xff]  ;;  %v176_v17 = vld [vmem:[%s1064_s3 + $0x40] sm:$0xff]  ;;  %v177_v18 = vld [vmem:[%s1064_s3 + $0x48] sm:$0xff] }
  0x3a   :  { %656 = vmatprep.subr.bf16.mxu1 %v655_v6  ;;  %v667_v16 = vpack.c.bf16 %v175_v15, %v174_v14  ;;  %v671_v19 = vpack.c.bf16 %v177_v18, %v176_v17  ;;  %v178_v20 = vld [vmem:[%s1064_s3 + $0x50] sm:$0xff]  ;;  %v179_v21 = vld [vmem:[%s1064_s3 + $0x58] sm:$0xff]  ;;  %v180_v23 = vld [vmem:[%s1064_s3 + $0x60] sm:$0xff] }
  0x3b   :  { %658 = vmatpush3.bf16.msra.mxu1 %v655_v6  ;;  %v675_v22 = vpack.c.bf16 %v179_v21, %v178_v20  ;;  %v181_v24 = vld [vmem:[%s1064_s3 + $0x68] sm:$0xff]  ;;  %v182_v25 = vld [vmem:[%s1064_s3 + $0x70] sm:$0xff]  ;;  %v183_v27 = vld [vmem:[%s1064_s3 + $0x78] sm:$0xff] }
  0x3c   :  { %660 = vmatprep.subr.bf16.mxu1 %v659_v9  ;;  %544 = vmatmul.mubr.msk.f32.vlgmr.msra.gmra.mrb[0].mxu0 %vm84_vm0, %v74_v12  ;;  %v679_v26 = vpack.c.bf16 %v181_v24, %v180_v23  ;;  %v683_v28 = vpack.c.bf16 %v183_v27, %v182_v25  ;;  %v268_v29 = vld [vmem:[#allocation6] sm:$0xff]  ;;  %v269_v30 = vld [vmem:[#allocation6 + $0x8] sm:$0xff]  ;;  %v270_v31 = vld [vmem:[#allocation6 + $0x10] sm:$0xff] }
  0x3d   :  { %v687_v32 = vpack.c.bf16 %v269_v30, %v268_v29  ;;  %v271_v33 = vld [vmem:[#allocation6 + $0x18] sm:$0xff]  ;;  %v272_v35 = vld [vmem:[#allocation6 + $0x20] sm:$0xff]  ;;  %v273_v36 = vld [vmem:[#allocation6 + $0x28] sm:$0xff] }
  0x3e   :  { %v691_v34 = vpack.c.bf16 %v271_v33, %v270_v31  ;;  %v695_v37 = vpack.c.bf16 %v273_v36, %v272_v35  ;;  %v274_v38 = vld [vmem:[#allocation6 + $0x30] sm:$0xff]  ;;  %v275_v39 = vld [vmem:[#allocation6 + $0x38] sm:$0xff]  ;;  %v475_v41 = vld [vmem:[%s1063_s2] ss:$0 sm:$0xff] }
  0x3f   :  { %662 = vmatpush3.bf16.msra.mxu1 %v659_v9  ;;  %688 = vmatprep.subr.bf16.mxu0 %v687_v32  ;;  %v699_v40 = vpack.c.bf16 %v275_v39, %v274_v38  ;;  %v276_v48 = vld [vmem:[#allocation6 + $0x40] sm:$0xff]  ;;  %v277_v49 = vld [vmem:[#allocation6 + $0x48] sm:$0xff]  ;;  %v278_v51 = vld [vmem:[#allocation6 + $0x50] sm:$0xff] }
  0x40   :  { %664 = vmatprep.subr.bf16.mxu1 %v663_v13  ;;  %690 = vmatpush3.bf16.msra.mxu0 %v687_v32  ;;  %v703_v50 = vpack.c.bf16 %v277_v49, %v276_v48  ;;  %v279_v52 = vld [vmem:[#allocation6 + $0x58] sm:$0xff]  ;;  %v280_v54 = vld [vmem:[#allocation6 + $0x60] sm:$0xff]  ;;  %v281_v55 = vld [vmem:[#allocation6 + $0x68] sm:$0xff] }
  0x41   :  { %692 = vmatprep.subr.bf16.mxu0 %v691_v34  ;;  %v707_v53 = vpack.c.bf16 %v279_v52, %v278_v51  ;;  %v282_v56 = vld [vmem:[#allocation6 + $0x70] sm:$0xff]  ;;  %v711_v57 = vpack.c.bf16 %v281_v55, %v280_v54  ;;  %v283_v58 = vld [vmem:[#allocation6 + $0x78] sm:$0xff]  ;;  %v368_v60 = vld [vmem:[%s1068_s7] sm:$0xff] }
  0x42   :  { %v715_v59 = vpack.c.bf16 %v283_v58, %v282_v56  ;;  %v369_v61 = vld [vmem:[%s1068_s7 + $0x8] sm:$0xff]  ;;  %v370_v62 = vld [vmem:[%s1068_s7 + $0x10] sm:$0xff]  ;;  %v371_v0 = vld [vmem:[%s1068_s7 + $0x18] sm:$0xff] }
  0x43   :  { %666 = vmatpush3.bf16.msra.mxu1 %v663_v13  ;;  %v719_v63 = vpack.c.bf16 %v369_v61, %v368_v60  ;;  %v723_v1 = vpack.c.bf16 %v371_v0, %v370_v62  ;;  %v372_v2 = vld [vmem:[%s1068_s7 + $0x20] sm:$0xff]  ;;  %v373_v3 = vld [vmem:[%s1068_s7 + $0x28] sm:$0xff]  ;;  %v374_v5 = vld [vmem:[%s1068_s7 + $0x30] sm:$0xff] }
  0x44   :  { %668 = vmatprep.subr.bf16.mxu1 %v667_v16  ;;  %694 = vmatpush3.bf16.msra.mxu0 %v691_v34  ;;  %v727_v4 = vpack.c.bf16 %v373_v3, %v372_v2  ;;  %v375_v6 = vld [vmem:[%s1068_s7 + $0x38] sm:$0xff]  ;;  %v478_v8 = vld [vmem:[%s1065_s4] ss:$0 sm:$0xff]  ;;  %v378_v18 = vld [vmem:[%s1068_s7 + $0x50] sm:$0xff] }
  0x45   :  { %696 = vmatprep.subr.bf16.mxu0 %v695_v37  ;;  %v731_v7 = vpack.c.bf16 %v375_v6, %v374_v5  ;;  %v376_v15 = vld [vmem:[%s1068_s7 + $0x40] sm:$0xff]  ;;  %v382_v23 = vld [vmem:[%s1068_s7 + $0x70] sm:$0xff]  ;;  %v383_v25 = vld [vmem:[%s1068_s7 + $0x78] sm:$0xff] }
  0x46   :  { %v380_v21 = vld [vmem:[%s1068_s7 + $0x60] sm:$0xff] }
  0x47   :  { %670 = vmatpush3.bf16.msra.mxu1 %v667_v16  ;;  %v377_v16 = vld [vmem:[%s1068_s7 + $0x48] sm:$0xff]  ;;  %v479_v27 = vld [vmem:[%s1067_s6] ss:$0 sm:$0xff] }
  0x48   :  { %672 = vmatprep.subr.bf16.mxu1 %v671_v19  ;;  %698 = vmatpush3.bf16.msra.mxu0 %v695_v37  ;;  %v735_v17 = vpack.c.bf16 %v377_v16, %v376_v15  ;;  %v480_v34 = vld [vmem:[%s1069_s8] ss:$0 sm:$0xff] }
  0x49   :  { %700 = vmatprep.subr.bf16.mxu0 %v699_v40 }
  0x4b   :  { %674 = vmatpush3.bf16.msra.mxu1 %v671_v19  ;;  %v379_v19 = vld [vmem:[%s1068_s7 + $0x58] sm:$0xff] }
  0x4c   :  { %676 = vmatprep.subr.bf16.mxu1 %v675_v22  ;;  %702 = vmatpush3.bf16.msra.mxu0 %v699_v40  ;;  %v739_v20 = vpack.c.bf16 %v379_v19, %v378_v18 }
  0x4d   :  { %704 = vmatprep.subr.bf16.mxu0 %v703_v50 }
  0x4f   :  { %678 = vmatpush3.bf16.msra.mxu1 %v675_v22  ;;  %v381_v22 = vld [vmem:[%s1068_s7 + $0x68] sm:$0xff] }
  0x50   :  { %680 = vmatprep.subr.bf16.mxu1 %v679_v26  ;;  %706 = vmatpush3.bf16.msra.mxu0 %v703_v50  ;;  %v743_v24 = vpack.c.bf16 %v381_v22, %v380_v21 }
  0x51   :  { %708 = vmatprep.subr.bf16.mxu0 %v707_v53 }
  0x53   :  { %682 = vmatpush3.bf16.msra.mxu1 %v679_v26  ;;  %v747_v26 = vpack.c.bf16 %v383_v25, %v382_v23 }
  0x54   :  { %684 = vmatprep.subr.bf16.mxu1 %v683_v28  ;;  %710 = vmatpush3.bf16.msra.mxu0 %v707_v53 }
  0x55   :  { %712 = vmatprep.subr.bf16.mxu0 %v711_v57 }
  0x57   :  { %686 = vmatpush3.bf16.msra.mxu1 %v683_v28 }
  0x58   :  { %714 = vmatpush3.bf16.msra.mxu0 %v711_v57  ;;  %720 = vmatprep.subr.bf16.mxu1 %v719_v63 }
  0x59   :  { %716 = vmatprep.subr.bf16.mxu0 %v715_v59 }
  0x5c   :  { %718 = vmatpush3.bf16.msra.mxu0 %v715_v59 }
 0x10f   :  { %v545_v42 = vpop.f32.mrb[0].mxu0 }
 0x110   :  { %v163_v43 = vadd.f32 %v545_v42, %v475_v41  ;;  %v157_v44 = vpop.f32.mrb[1].mxu0 }
 0x111   :  { %v158_v45 = vadd.f32 %v475_v41, %v157_v44 }
 0x113   :  { %756 = vtanh.f32 %v158_v45 }
 0x114   :  { %758 = vtanh.f32 %v163_v43 }
 0x11d   :  { %v757_v46 = vpop.eup %756 }
 0x11e   :  { %v759_v47 = vpop.eup %758  ;;  %578 = vmatprep.mubr.f32.mxu1 %v757_v46 }
 0x11f   :  { %579 = vmatmul.mubr.f32.vlgmr.msra.gmra.mrb[0].mxu1 %v759_v47 }
 0x120   :  { %722 = vmatpush3.bf16.msra.mxu1 %v719_v63 }
 0x121   :  { %724 = vmatprep.subr.bf16.mxu1 %v723_v1 }
 0x124   :  { %726 = vmatpush3.bf16.msra.mxu1 %v723_v1 }
 0x125   :  { %728 = vmatprep.subr.bf16.mxu1 %v727_v4 }
 0x128   :  { %730 = vmatpush3.bf16.msra.mxu1 %v727_v4 }
 0x129   :  { %732 = vmatprep.subr.bf16.mxu1 %v731_v7 }
 0x12c   :  { %734 = vmatpush3.bf16.msra.mxu1 %v731_v7 }
 0x12d   :  { %736 = vmatprep.subr.bf16.mxu1 %v735_v17 }
 0x130   :  { %738 = vmatpush3.bf16.msra.mxu1 %v735_v17 }
 0x131   :  { %740 = vmatprep.subr.bf16.mxu1 %v739_v20 }
 0x134   :  { %742 = vmatpush3.bf16.msra.mxu1 %v739_v20 }
 0x135   :  { %744 = vmatprep.subr.bf16.mxu1 %v743_v24 }
 0x138   :  { %746 = vmatpush3.bf16.msra.mxu1 %v743_v24 }
 0x139   :  { %748 = vmatprep.subr.bf16.mxu1 %v747_v26 }
 0x13c   :  { %750 = vmatpush3.bf16.msra.mxu1 %v747_v26 }
 0x1f2   :  { %v580_v9 = vpop.f32.mrb[0].mxu1 }
 0x1f3   :  { %v263_v10 = vadd.f32 %v580_v9, %v478_v8  ;;  %v257_v11 = vpop.f32.mrb[1].mxu1 }
 0x1f4   :  { %v258_v12 = vadd.f32 %v478_v8, %v257_v11 }
 0x1f6   :  { %760 = vtanh.f32 %v258_v12 }
 0x1f7   :  { %762 = vtanh.f32 %v263_v10 }
 0x200   :  { %v761_v13 = vpop.eup %760 }
 0x201   :  { %v763_v14 = vpop.eup %762  ;;  %613 = vmatprep.mubr.f32.mxu0 %v761_v13 }
 0x202   :  { %614 = vmatmul.mubr.f32.vlgmr.msra.gmra.mrb[2].mxu0 %v763_v14 }
 0x2d5   :  { %v615_v28 = vpop.f32.mrb[2].mxu0 }
 0x2d6   :  { %v363_v29 = vadd.f32 %v615_v28, %v479_v27  ;;  %v357_v30 = vpop.f32.mrb[3].mxu0 }
 0x2d7   :  { %v358_v31 = vadd.f32 %v479_v27, %v357_v30 }
 0x2d9   :  { %764 = vtanh.f32 %v358_v31 }
 0x2da   :  { %766 = vtanh.f32 %v363_v29 }
 0x2e3   :  { %v765_v32 = vpop.eup %764 }
 0x2e4   :  { %v767_v33 = vpop.eup %766  ;;  %648 = vmatprep.mubr.f32.mxu1 %v765_v32 }
 0x2e5   :  { %649 = vmatmul.mubr.f32.vlgmr.msra.gmra.mrb[2].mxu1 %v767_v33 }
 0x3b8   :  { %v650_v35 = vpop.f32.mrb[2].mxu1 }
 0x3b9   :  { %v463_v36 = vadd.f32 %v650_v35, %v480_v34  ;;  %v457_v37 = vpop.f32.mrb[3].mxu1 }
 0x3ba   :  { %v458_v38 = vadd.f32 %v480_v34, %v457_v37 }
 0x3bb   :  { %468 = vst.msk [vmem:[%s1070_s9 + $0x8] sm:$0xff] %vm466_vm1, %v463_v36 }
 0x3bc   :  { %467 = vst.msk [vmem:[%s1070_s9] sm:$0xff] %vm466_vm1, %v458_v38 }
 0x3bd   :  { %473 = vsyncpa [#allocation3], 1 }
 0x3be   :  { %474 = vsyncpa [#allocation5], 1 }

</bundles_post_ra>
